<compile_context>
chip_gen: v6e
topology: v6e:2x2x1
jax: 0.10.0
libtpu: 0.0.40
codegen_flags: <defaults>
</compile_context>

<pallas_src>
import functools

import jax
import jax.numpy as jnp
from jax.experimental import pallas as pl
from jax.experimental.pallas import tpu as pltpu


def _contrastive_loss_kernel(x1_ref, x2_ref, lab_ref, out_ref, *,
                             margin, eps, total_rows, block_rows,
                             blocks_per_core, n_blocks):
    c = pl.program_id(0)          # core axis (size 1 on single-TC chips)
    i = pl.program_id(1)          # batch-tile axis ("arbitrary" reduction)

    # The output block is resident across the i axis -> it is the per-core
    # accumulator (exactly one f32 vreg).  Zero it once per core.
    @pl.when(i == 0)
    def _init():
        out_ref[...] = jnp.zeros_like(out_ref)

    blk = c * blocks_per_core + i                     # logical tile id
    blk_mem = jnp.minimum(blk, n_blocks - 1)          # clamped (2-core odd split)

    x1 = x1_ref[...].astype(jnp.float32)              # (TB, D)
    x2 = x2_ref[...].astype(jnp.float32)              # (TB, D)

    # Label is resident in VMEM for the whole kernel (single DMA); slice the
    # rows belonging to this tile.
    if n_blocks == 1:
        lab = lab_ref[...]
    else:
        start = pl.multiple_of(blk_mem * block_rows, 8)
        lab = lab_ref[pl.ds(start, block_rows), :]
    lab = lab.astype(jnp.float32)                     # (TB, 1)

    # F.pairwise_distance: ||x1 - x2 + eps||_2 along the feature dim.
    diff = x1 - x2 + eps
    d2 = jnp.sum(diff * diff, axis=-1, keepdims=True)  # (TB, 1)
    d = jnp.sqrt(d2)                                    # euclidean_distance
    hinge = jnp.maximum(margin - d, 0.0)
    per_row = lab * d2 + (1.0 - lab) * (hinge * hinge)  # (TB, 1)

    # Only the ragged last tile (and clamped duplicate tiles on the 2-core
    # split) can contain rows >= total_rows; mask those, skip it elsewhere.
    needs_mask = blk * block_rows + block_rows > total_rows

    @pl.when(needs_mask)
    def _acc_masked():
        rows = blk * block_rows + jax.lax.broadcasted_iota(
            jnp.int32, per_row.shape, 0)
        masked = jnp.where(rows < total_rows, per_row, 0.0)
        out_ref[...] += jnp.sum(masked)

    @pl.when(jnp.logical_not(needs_mask))
    def _acc():
        out_ref[...] += jnp.sum(per_row)


def _tensorcores_per_chip():
    """2 only on v7x-class chips (2 TCs/chip); v5e/v6e/unknown -> 1."""
    try:
        kind = jax.devices()[0].device_kind.lower()
    except Exception:
        return 1
    return 2 if "v7" in kind else 1


def contrastive_loss(output1, output2, label, margin=2.0, eps=1e-6,
                     block_rows=None):
    """output1, output2: (B, D); label: (B, 1). Returns scalar f32 loss."""
    B, D = output1.shape
    assert output2.shape == (B, D)
    assert label.shape == (B, 1)

    itemsize = jnp.dtype(output1.dtype).itemsize
    # Minimum sublane tile per dtype: f32 -> 8, bf16 -> 16, int8/fp8 -> 32.
    sublane = {4: 8, 2: 16, 1: 32}.get(itemsize, 8)

    # Tile rows: ~4 MiB per feature input per pipeline buffer (keeps the fixed
    # ~0.35 us per-step overhead under ~10% on every generation), rounded to
    # the dtype sublane multiple.
    if block_rows is None:
        target_tile_bytes = 4 * 1024 * 1024
        tb = (target_tile_bytes // max(D * itemsize, 1)) // sublane * sublane
        tb = max(sublane, tb)
    else:
        tb = max(sublane, (block_rows // sublane) * sublane)
    if tb >= B:
        tb = B                      # single full-extent tile
    tb = int(tb)

    n_blocks = int(pl.cdiv(B, tb))

    # Real core split only where there are 2 TensorCores (v7x); on single-TC
    # v5e/v6e a second "core" would just be a serial outer loop (pure overhead).
    np_cores = 2 if (_tensorcores_per_chip() >= 2 and n_blocks >= 2) else 1
    bpc = int(pl.cdiv(n_blocks, np_cores))

    # Label is tiny (B*4 bytes): cast to f32 and pad to a whole number of
    # tiles so in-kernel slicing is always in bounds.  Features are NOT padded.
    lab_rows = n_blocks * tb
    label = label.astype(jnp.float32)
    if lab_rows != B:
        label = jnp.pad(label, ((0, lab_rows - B), (0, 0)))

    kernel = functools.partial(
        _contrastive_loss_kernel, margin=margin, eps=eps, total_rows=B,
        block_rows=tb, blocks_per_core=bpc, n_blocks=n_blocks)

    if np_cores == 1:
        feat_map = lambda c, i: (i, 0)
    else:
        # Clamp possibly out-of-range tile ids of the second core's tail to a
        # valid tile; its rows are masked out in the kernel.
        feat_map = lambda c, i: (jnp.minimum(c * bpc + i, n_blocks - 1), 0)
    lab_map = lambda c, i: (0, 0)
    out_map = lambda c, i: (c, 0)

    if np_cores > 1:
        dim_sems = (getattr(pltpu, "CORE_PARALLEL", "parallel"), "arbitrary")
    else:
        dim_sems = ("arbitrary", "arbitrary")

    # Explicit scoped-VMEM budget: 2 feature inputs x 2 pipeline buffers plus
    # the resident label and the per-core output vreg.  (v5e default scoped
    # VMEM is only 16 MiB; v7x physical VMEM is 64 MiB.)
    tile_bytes = tb * D * itemsize
    vmem_needed = (2 * 2 * tile_bytes + 2 * lab_rows * 4
                   + np_cores * 8 * 128 * 4 * 2)
    vmem_limit = int(min(max(vmem_needed + (2 << 20), 16 << 20), 128 << 20))

    partials = pl.pallas_call(
        kernel,
        out_shape=jax.ShapeDtypeStruct((np_cores * 8, 128), jnp.float32),
        grid=(np_cores, bpc),
        in_specs=[
            pl.BlockSpec((tb, D), feat_map),
            pl.BlockSpec((tb, D), feat_map),
            pl.BlockSpec((lab_rows, 1), lab_map),
        ],
        out_specs=pl.BlockSpec((8, 128), out_map),
        compiler_params=pltpu.CompilerParams(
            dimension_semantics=dim_sems,
            vmem_limit_bytes=vmem_limit),
        cost_estimate=pl.CostEstimate(
            flops=4 * B * D,
            transcendentals=B,
            bytes_accessed=2 * B * D * itemsize + B * 4 + np_cores * 8 * 128 * 4),
    )(output1, output2, label)

    # Every element of core c's (8, 128) output block holds that core's partial
    # sum; pick one element per core and normalize by the true batch size.
    return jnp.sum(partials[0::8, 0]) / B


def _reference_loss(output1, output2, label, margin=2.0, eps=1e-6):
    diff = output1.astype(jnp.float32) - output2.astype(jnp.float32) + eps
    d = jnp.sqrt(jnp.sum(diff * diff, axis=-1, keepdims=True))
    lab = label.astype(jnp.float32)
    return jnp.mean(lab * d**2 + (1.0 - lab) * jnp.maximum(margin - d, 0.0) ** 2)


if __name__ == "__main__":
    key = jax.random.PRNGKey(0)
    k1, k2, k3 = jax.random.split(key, 3)

    # Small embedding batch consistent with a siamese-net head.
    B, D = 8, 128
    output1 = jax.random.normal(k1, (B, D), dtype=jnp.float32)
    output2 = jax.random.normal(k2, (B, D), dtype=jnp.float32)
    label = jax.random.bernoulli(k3, p=0.5, shape=(B, 1)).astype(jnp.float32)

    loss = jax.block_until_ready(contrastive_loss(output1, output2, label, margin=2.0))
    ref = _reference_loss(output1, output2, label, margin=2.0)
    assert jnp.allclose(loss, ref, rtol=1e-5, atol=1e-5), (loss, ref)

    # Ragged batch: exercises the un-padded features + masked last tile path.
    B2, D2 = 37, 96
    o1 = jax.random.normal(k1, (B2, D2), dtype=jnp.float32)
    o2 = jax.random.normal(k2, (B2, D2), dtype=jnp.float32)
    lb = jax.random.bernoulli(k3, p=0.5, shape=(B2, 1)).astype(jnp.float32)
    loss2 = jax.block_until_ready(
        contrastive_loss(o1, o2, lb, margin=2.0, block_rows=8))
    ref2 = _reference_loss(o1, o2, lb, margin=2.0)
    assert jnp.allclose(loss2, ref2, rtol=1e-5, atol=1e-5), (loss2, ref2)

    # bf16 inputs: exercises the dtype-aware sublane (16-row) tiling path.
    B3, D3 = 64, 256
    o1b = jax.random.normal(k1, (B3, D3), dtype=jnp.float32).astype(jnp.bfloat16)
    o2b = jax.random.normal(k2, (B3, D3), dtype=jnp.float32).astype(jnp.bfloat16)
    lbb = jax.random.bernoulli(k3, p=0.5, shape=(B3, 1)).astype(jnp.float32)
    loss3 = jax.block_until_ready(
        contrastive_loss(o1b, o2b, lbb, margin=2.0, block_rows=16))
    ref3 = _reference_loss(o1b, o2b, lbb, margin=2.0)
    assert jnp.allclose(loss3, ref3, rtol=1e-4, atol=1e-4), (loss3, ref3)

    print("KERNEL_OK")
</pallas_src>

<mosaic_0001>
module attributes {stable_mosaic.version = 11 : i64} {
  func.func @_contrastive_loss_kernel(%arg0: i32, %arg1: i32, %arg2: memref<8x128xf32, #tpu.memory_space<vmem>>, %arg3: memref<8x128xf32, #tpu.memory_space<vmem>>, %arg4: memref<8x1xf32, #tpu.memory_space<vmem>>, %arg5: memref<8x128xf32, #tpu.memory_space<vmem>>) attributes {dimension_semantics = [#tpu.dimension_semantics<arbitrary>, #tpu.dimension_semantics<arbitrary>], iteration_bounds = array<i64: 1, 1>, scalar_prefetch = 0 : i64, scratch_operands = 0 : i64, tpu.core_type = #tpu.core_type<tc>, window_params = [{transform_indices = @transform_0, window_bounds = array<i64: 8, 128>}, {transform_indices = @transform_1, window_bounds = array<i64: 8, 128>}, {pipeline_mode = #tpu.pipeline_mode<synchronous>, transform_indices = @transform_2, window_bounds = array<i64: 8, 1>}, {transform_indices = @transform_3, window_bounds = array<i64: 8, 128>}]} {
    %c0_i32 = arith.constant 0 : i32
    %0 = arith.cmpi eq, %arg1, %c0_i32 : i32
    %1 = arith.extui %0 : i1 to i32
    %c0_i32_0 = arith.constant 0 : i32
    %2 = arith.cmpi ne, %1, %c0_i32_0 : i32
    scf.if %2 {
      %cst_14 = arith.constant 0.000000e+00 : f32
      %33 = vector.broadcast %cst_14 : f32 to vector<8x128xf32>
      %c0_15 = arith.constant 0 : index
      %c0_16 = arith.constant 0 : index
      %34 = vector.load %arg5[%c0_15, %c0_16] : memref<8x128xf32, #tpu.memory_space<vmem>>, vector<8x128xf32>
      tpu.vector_store %arg5[%c0_15, %c0_16], %33 {strides = array<i32>} : memref<8x128xf32, #tpu.memory_space<vmem>>, vector<8x128xf32>,
    } else {
    }
    %c1_i32 = arith.constant 1 : i32
    %3 = arith.muli %arg0, %c1_i32 : i32
    %4 = arith.addi %3, %arg1 : i32
    %c0 = arith.constant 0 : index
    %c0_1 = arith.constant 0 : index
    %5 = vector.load %arg2[%c0, %c0_1] : memref<8x128xf32, #tpu.memory_space<vmem>>, vector<8x128xf32>
    %c0_2 = arith.constant 0 : index
    %c0_3 = arith.constant 0 : index
    %6 = vector.load %arg3[%c0_2, %c0_3] : memref<8x128xf32, #tpu.memory_space<vmem>>, vector<8x128xf32>
    %c0_4 = arith.constant 0 : index
    %c0_5 = arith.constant 0 : index
    %7 = vector.load %arg4[%c0_4, %c0_5] : memref<8x1xf32, #tpu.memory_space<vmem>>, vector<8x1xf32>
    %8 = arith.subf %5, %6 : vector<8x128xf32>
    %cst = arith.constant 9.99999997E-7 : f32
    %9 = vector.broadcast %cst : f32 to vector<8x128xf32>
    %10 = arith.addf %8, %9 : vector<8x128xf32>
    %11 = arith.mulf %10, %10 : vector<8x128xf32>
    %cst_6 = arith.constant dense<0.000000e+00> : vector<8xf32>
    %12 = vector.multi_reduction <add>, %11, %cst_6 [1] : vector<8x128xf32> to vector<8xf32>
    %13 = vector.shape_cast %12 : vector<8xf32> to vector<8x1xf32>
    %14 = math.sqrt %13 : vector<8x1xf32>
    %cst_7 = arith.constant 2.000000e+00 : f32
    %15 = vector.broadcast %cst_7 : f32 to vector<8x1xf32>
    %16 = arith.subf %15, %14 : vector<8x1xf32>
    %cst_8 = arith.constant 0.000000e+00 : f32
    %17 = vector.broadcast %cst_8 : f32 to vector<8x1xf32>
    %18 = arith.maximumf %16, %17 : vector<8x1xf32>
    %19 = arith.mulf %7, %13 : vector<8x1xf32>
    %cst_9 = arith.constant 1.000000e+00 : f32
    %20 = vector.broadcast %cst_9 : f32 to vector<8x1xf32>
    %21 = arith.subf %20, %7 : vector<8x1xf32>
    %22 = arith.mulf %18, %18 : vector<8x1xf32>
    %23 = arith.mulf %21, %22 : vector<8x1xf32>
    %24 = arith.addf %19, %23 : vector<8x1xf32>
    %c8_i32 = arith.constant 8 : i32
    %25 = arith.muli %4, %c8_i32 : i32
    %c8_i32_10 = arith.constant 8 : i32
    %26 = arith.addi %25, %c8_i32_10 : i32
    %c8_i32_11 = arith.constant 8 : i32
    %27 = arith.cmpi sgt, %26, %c8_i32_11 : i32
    %28 = arith.extui %27 : i1 to i32
    %c0_i32_12 = arith.constant 0 : i32
    %29 = arith.cmpi ne, %28, %c0_i32_12 : i32
    scf.if %29 {
      %c8_i32_14 = arith.constant 8 : i32
      %33 = arith.muli %4, %c8_i32_14 : i32
      %34 = tpu.iota {dimensions = array<i32: 0>} : vector<8x1xi32>
      %35 = vector.broadcast %33 : i32 to vector<8x1xi32>
      %36 = arith.addi %35, %34 : vector<8x1xi32>
      %c8_i32_15 = arith.constant 8 : i32
      %37 = vector.broadcast %c8_i32_15 : i32 to vector<8x1xi32>
      %38 = arith.cmpi slt, %36, %37 : vector<8x1xi32>
      %cst_16 = arith.constant 0.000000e+00 : f32
      %39 = vector.broadcast %cst_16 : f32 to vector<8x1xf32>
      %40 = arith.select %38, %24, %39 : vector<8x1xi1>, vector<8x1xf32>
      %c0_17 = arith.constant 0 : index
      %c0_18 = arith.constant 0 : index
      %41 = vector.load %arg5[%c0_17, %c0_18] : memref<8x128xf32, #tpu.memory_space<vmem>>, vector<8x128xf32>
      %42 = vector.shape_cast %40 : vector<8x1xf32> to vector<1x8x1xf32>
      %cst_19 = arith.constant dense<0.000000e+00> : vector<1xf32>
      %43 = vector.multi_reduction <add>, %42, %cst_19 [1, 2] : vector<1x8x1xf32> to vector<1xf32>
      %44 = vector.shape_cast %43 : vector<1xf32> to vector<1x1x1xf32>
      %45 = vector.extract %44[0, 0, 0] : f32 from vector<1x1x1xf32>
      %46 = vector.broadcast %45 : f32 to vector<8x128xf32>
      %47 = arith.addf %41, %46 : vector<8x128xf32>
      %c0_20 = arith.constant 0 : index
      %c0_21 = arith.constant 0 : index
      %48 = vector.load %arg5[%c0_20, %c0_21] : memref<8x128xf32, #tpu.memory_space<vmem>>, vector<8x128xf32>
      tpu.vector_store %arg5[%c0_20, %c0_21], %47 {strides = array<i32>} : memref<8x128xf32, #tpu.memory_space<vmem>>, vector<8x128xf32>,
    } else {
    }
    %true = arith.constant true
    %30 = arith.xori %27, %true : i1
    %31 = arith.extui %30 : i1 to i32
    %c0_i32_13 = arith.constant 0 : i32
    %32 = arith.cmpi ne, %31, %c0_i32_13 : i32
    scf.if %32 {
      %c0_14 = arith.constant 0 : index
      %c0_15 = arith.constant 0 : index
      %33 = vector.load %arg5[%c0_14, %c0_15] : memref<8x128xf32, #tpu.memory_space<vmem>>, vector<8x128xf32>
      %34 = vector.shape_cast %24 : vector<8x1xf32> to vector<1x8x1xf32>
      %cst_16 = arith.constant dense<0.000000e+00> : vector<1xf32>
      %35 = vector.multi_reduction <add>, %34, %cst_16 [1, 2] : vector<1x8x1xf32> to vector<1xf32>
      %36 = vector.shape_cast %35 : vector<1xf32> to vector<1x1x1xf32>
      %37 = vector.extract %36[0, 0, 0] : f32 from vector<1x1x1xf32>
      %38 = vector.broadcast %37 : f32 to vector<8x128xf32>
      %39 = arith.addf %33, %38 : vector<8x128xf32>
      %c0_17 = arith.constant 0 : index
      %c0_18 = arith.constant 0 : index
      %40 = vector.load %arg5[%c0_17, %c0_18] : memref<8x128xf32, #tpu.memory_space<vmem>>, vector<8x128xf32>
      tpu.vector_store %arg5[%c0_17, %c0_18], %39 {strides = array<i32>} : memref<8x128xf32, #tpu.memory_space<vmem>>, vector<8x128xf32>,
    } else {
    }
    return
  }
  func.func @transform_0(%arg0: i32, %arg1: i32) -> (i32, i32) {
    %c0_i32 = arith.constant 0 : i32
    %c0_i32_0 = arith.constant 0 : i32
    return %arg1, %c0_i32 : i32, i32
  }
  func.func @transform_1(%arg0: i32, %arg1: i32) -> (i32, i32) {
    %c0_i32 = arith.constant 0 : i32
    %c0_i32_0 = arith.constant 0 : i32
    return %arg1, %c0_i32 : i32, i32
  }
  func.func @transform_2(%arg0: i32, %arg1: i32) -> (i32, i32) {
    %c0_i32 = arith.constant 0 : i32
    %c0_i32_0 = arith.constant 0 : i32
    %c0_i32_1 = arith.constant 0 : i32
    return %c0_i32, %c0_i32_0 : i32, i32
  }
  func.func @transform_3(%arg0: i32, %arg1: i32) -> (i32, i32) {
    %c0_i32 = arith.constant 0 : i32
    %c0_i32_0 = arith.constant 0 : i32
    return %arg0, %c0_i32 : i32, i32
  }
}

</mosaic_0001>

<bundles_post_ra>
// kernel: tpu_custom_call.1
= control target key start
LH: loop header
LB: loop body
LE: loop exit
PB: predicated region body
PF: predicated region fallthrough
CT: control target
= control target key end

     0   :  { %8 = vsyncpa [#allocation3], 0  ;;  %s201_s0 = inlined_call_operand.vmem [shape: f32[8,128], index: 0, kind: input, shape index: {}]   ;;  %s202_s1 = inlined_call_operand.hbm [shape: f32[8,128], index: 1, kind: input, shape index: {}]   ;;  %s203_s2 = inlined_call_operand.vmem [shape: f32[8,1], index: 2, kind: input, shape index: {}]   ;;  %s204_s3 = inlined_call_operand.hbm [shape: f32[8,128], index: 3, kind: output, shape index: {}]  }
   0x1   :  { %9 = vsyncpa [#allocation4], 0  ;;  %s167_s12 = smov [#allocation2]  }
   0x2   :  { %s18_s13 = sshll.u32 %s167_s12, 4  ;;  %s19_s13 = int_to_ptr.vmem [resolvable:$true] %s18_s13 }
   0x3   :  { %s131_s14 = scalar_lea.vmem %s19_s13, 128  ;;  %p136_p1 = scmp.lt.s32.totalorder %s19_s13, %s19_s13 }
   0x4   :  { %p132_p0 = scmp.ne.s32.totalorder %s19_s13, %s131_s14  ;;  %p137_p2 = scmp.lt.s32.totalorder %s131_s14, %s131_s14 }
   0x6   :  { %p138_p3 = por %p137_p2, %p136_p1 }
   0x8   :  { %p139_p4 = pnand %p138_p3, %p132_p0 }
   0xa   :  { %142 = shalt.err (!%p139_p4)
}
   0xb   :  { %21 = dma.hbm_to_vmem [thread:$0]  %s202_s1, 128, %s19_s13, [#allocation3]  }
   0xc   :  { %163 = dma.done.wait [#allocation3], 128  }
   0xd   :  { %164 = vsyncadd [#allocation3], 4294967168  ;;  %v33_v0 = vld [vmem:[%s201_s0] sm:$0xff]  ;;  %vm87_vm2 = vcmask 7168   ;;  %s168_s0 = smov [#allocation5]  }
   0xe   :  { %v34_v1 = vld [vmem:[#allocation2] sm:$0xff]  ;;  %s107_s20 = sshll.u32 %s168_s0, 4  ;;  %s108_s20 = int_to_ptr.vmem [resolvable:$true] %s107_s20 }
   0xf   :  { %v36_v2 = vsub.f32 %v33_v0, %v34_v1  ;;  %v35_v12 = vld [vmem:[%s203_s2] sm:$0xff]  ;;  %s143_s21 = scalar_lea.vmem %s108_s20, 128  ;;  %p148_p6 = scmp.lt.s32.totalorder %s108_s20, %s108_s20 }
  0x10   :  { %v51_v14 = vsub.f32 1.0, %v35_v12  ;;  %p144_p5 = scmp.ne.s32.totalorder %s108_s20, %s143_s21  ;;  %p149_p7 = scmp.lt.s32.totalorder %s143_s21, %s143_s21 }
  0x11   :  { %v37_v3 = vadd.f32 1e-06, %v36_v2 }
  0x12   :  { %p150_p8 = por %p149_p7, %p148_p6 }
  0x13   :  { %v38_v4 = vmul.f32 %v37_v3, %v37_v3 }
  0x14   :  { %p151_p9 = pnand %p150_p8, %p144_p5 }
  0x15   :  { %39 = vadd.xlane.f32.xlu0 %v38_v4 }
  0x9e   :  { %v40_v5 = vpop.xlane.xlu0 %39 }
  0x9f   :  { %121 = vrsqrt.f32 %v40_v5  ;;  %vm43_vm0 = vcmp.eq.f32.partialorder %v40_v5, inf  ;;  %v46_v8 = vand.u32 2147483648, %v40_v5  ;;  %vm45_vm1 = vcmp.eq.f32.partialorder %v40_v5, 0.0 }
  0xa0   :  { %v50_v16 = vmul.f32 %v40_v5, %v35_v12 }
  0xac   :  { %v122_v6 = vpop.eup %121 }
  0xad   :  { %v42_v7 = vmul.f32 %v122_v6, %v40_v5 }
  0xaf   :  { %v44_v9 = vsel %vm43_vm0, %v40_v5, %v42_v7 }
  0xb0   :  { %v47_v10 = vsel %vm45_vm1, %v46_v8, %v44_v9 }
  0xb1   :  { %v48_v11 = vsub.f32 2.0, %v47_v10 }
  0xb3   :  { %v49_v13 = vmax.f32 %v48_v11, 0.0 }
  0xb5   :  { %v52_v15 = vmul.f32 %v49_v13, %v49_v13 }
  0xb7   :  { %v53_v17 = vmul.f32 %v52_v15, %v51_v14 }
  0xb9   :  { %v54_v18 = vadd.f32 %v53_v17, %v50_v16 }
  0xbb   :  { %v88_v19 = vsel %vm87_vm2, %v54_v18, 0.0 }
  0xbc   :  { %89 = vadd.xlane.f32.xlu0 %v88_v19 }
 0x145   :  { %v90_v20 = vpop.xlane.xlu0 %89 }
 0x146   :  { %v91_v21 = vrot.slane %v90_v20, 4 }
 0x148   :  { %v92_v22 = vadd.f32 %v91_v21, %v90_v20 }
 0x14a   :  { %v93_v23 = vrot.slane %v92_v22, 2 }
 0x14c   :  { %v94_v24 = vadd.f32 %v93_v23, %v92_v22 }
 0x14e   :  { %v95_v25 = vrot.slane %v94_v24, 1 }
 0x150   :  { %v96_v26 = vadd.f32 %v95_v25, %v94_v24 }
 0x152   :  { %116 = vpush %v96_v26 }
 0x183   :  { %s117_s2 = spop %116 }
 0x184   :  { %v98_v27 = vstv %s117_s2 }
 0x185   :  { %100 = vst [vmem:[#allocation5] sm:$0xff] %v98_v27 }
 0x186   :  { %154 = shalt.err (!%p151_p9)
}
 0x187   :  { %110 = dma.vmem_to_hbm [thread:$0]  %s108_s20, 128, %s204_s3, [#allocation4]  }
 0x188   :  { %165 = dma.done.wait [#allocation4], 128  }
 0x189   :  { %166 = vsyncadd [#allocation4], 4294967168 }
 0x18a   :  { %114 = vsyncpa [#allocation3], 1 }
 0x18b   :  { %115 = vsyncpa [#allocation4], 1 }

</bundles_post_ra>
